<compile_context>
chip_gen: v7x
topology: tpu7x:2x2x1
jax: 0.10.0
libtpu: 0.0.40
codegen_flags: <defaults>
</compile_context>

<pallas_src>
from types import SimpleNamespace

import jax
import jax.numpy as jnp
from jax.experimental import pallas as pl
from jax.experimental.pallas import tpu as pltpu


def _pick_pixel_tile(num_pixels, max_tile=2048):
    """Largest multiple of 128 that divides num_pixels, capped at max_tile."""
    if num_pixels % 128 != 0:
        raise ValueError(
            f"H*W = {num_pixels} must be a multiple of 128 for the fused kernel")
    best = 128
    t = 128
    limit = min(num_pixels, max_tile)
    while t <= limit:
        if num_pixels % t == 0:
            best = t
        t += 128
    return best


def _make_model_loss_kernel(n_parts):
    """Kernel factory: fused multi-input 1x1 conv + sigmoid + per-lane MSE partials."""

    def kernel(*refs):
        x_refs = refs[:n_parts]                  # each (1, C_p, TP)
        w_refs = refs[n_parts:2 * n_parts]       # each (Cout, C_p)
        b_ref = refs[2 * n_parts]                # (Cout, 1)
        t_ref = refs[2 * n_parts + 1]            # (1, Cout, TP) target tile
        y_ref = refs[2 * n_parts + 2]            # (1, Cout, TP) model-output tile
        loss_ref = refs[2 * n_parts + 3]         # (1, Cout, TP) loss partials (resident over j)

        j = pl.program_id(1)

        @pl.when(j == 0)
        def _():
            loss_ref[...] = jnp.zeros_like(loss_ref)

        # Channels-first 1x1 conv: sum_p  W_p (Cout, C_p) @ X_p (C_p, TP), f32 accumulate.
        z = None
        for p in range(n_parts):
            w = w_refs[p][...]
            x = x_refs[p][0]
            if w.shape[1] == 1:
                # K=1 contraction: VPU broadcast outer-product instead of a degenerate MXU op.
                part = w * x
            else:
                part = jnp.dot(w, x, preferred_element_type=jnp.float32)
            z = part if z is None else z + part
        z = z + b_ref[...]                        # (Cout, TP) + (Cout, 1) broadcast
        y = jax.nn.sigmoid(z)
        y_ref[0] = y.astype(y_ref.dtype)          # lane-dense store (TP lanes)

        # MSE partial sums: pure elementwise accumulation (no in-kernel cross-lane reduce).
        d = y - t_ref[0]
        loss_ref[0] += d * d

    return kernel


def fused_model_and_loss(x_parts, w_parts, b, target, *, max_tile=2048):
    """x_parts[p]: (N, C_p, P) f32, w_parts[p]: (Cout, C_p), b: (Cout, 1), target: (N, Cout, P).

    Returns (y, loss_partials) with y: (N, Cout, P) and loss_partials: (N, Cout, TP).
    """
    n_parts = len(x_parts)
    N, Cout, P = target.shape
    TP = _pick_pixel_tile(P, max_tile)
    grid = (N, P // TP)

    in_specs = []
    for xp in x_parts:
        c = xp.shape[1]
        in_specs.append(pl.BlockSpec((1, c, TP), lambda n, j: (n, 0, j)))
    for wp in w_parts:
        c = wp.shape[1]
        in_specs.append(pl.BlockSpec((Cout, c), lambda n, j: (0, 0)))   # resident weights
    in_specs.append(pl.BlockSpec((Cout, 1), lambda n, j: (0, 0)))       # resident bias
    in_specs.append(pl.BlockSpec((1, Cout, TP), lambda n, j: (n, 0, j)))  # target tile

    out_specs = [
        pl.BlockSpec((1, Cout, TP), lambda n, j: (n, 0, j)),  # y tile
        pl.BlockSpec((1, Cout, TP), lambda n, j: (n, 0, 0)),  # per-batch loss partials
    ]

    Cin = sum(wp.shape[1] for wp in w_parts)
    flops = 2 * N * P * Cin * Cout
    bytes_accessed = 4 * (N * P * Cin          # activations read
                          + 2 * N * P * Cout   # target read + y write
                          + N * Cout * TP)     # loss partials write
    cost = pl.CostEstimate(flops=flops,
                           transcendentals=N * P * Cout,
                           bytes_accessed=bytes_accessed)

    y, loss_part = pl.pallas_call(
        _make_model_loss_kernel(n_parts),
        out_shape=(
            jax.ShapeDtypeStruct((N, Cout, P), jnp.float32),
            jax.ShapeDtypeStruct((N, Cout, TP), jnp.float32),
        ),
        grid_spec=pltpu.PrefetchScalarGridSpec(
            num_scalar_prefetch=0,
            grid=grid,
            in_specs=in_specs,
            out_specs=out_specs,
        ),
        compiler_params=pltpu.CompilerParams(
            # batch axis megacore-shardable; pixel-chunk axis carries the loss accumulation
            dimension_semantics=("parallel", "arbitrary"),
        ),
        cost_estimate=cost,
    )(*x_parts, *w_parts, b, target)
    return y, loss_part


class ModelWithLoss:
    """JAX/Pallas equivalent of the PyTorch ModelWithLoss wrapper."""

    def __init__(self, w, b, args):
        # w: (Cin, Cout) 1x1-conv weight (channels-last convention); stored channels-first.
        self.w_t = jnp.asarray(w, jnp.float32).T            # (Cout, Cin)
        self.b = jnp.asarray(b, jnp.float32).reshape(-1, 1)  # (Cout, 1)
        self.args = args

    def __call__(self, batch):
        pre_img = batch['pre_img'] if 'pre_img' in batch else None
        pre_hm = batch['pre_hm'] if 'pre_hm' in batch else None
        image = batch['image']

        # Same channel ordering as torch.cat([image, cat([pre_img, *prev_frames]), pre_hm], dim=1),
        # but passed as separate kernel inputs (no concat pass over HBM).
        parts = [image]
        if pre_img is not None:
            parts.append(pre_img)
        parts.extend(batch['prev_frames'])
        if self.args.pre_hm:
            parts.append(pre_hm)

        N, _, H, W = image.shape
        P = H * W
        Cin_total = sum(p.shape[1] for p in parts)
        assert Cin_total == self.w_t.shape[1], "channel count must match conv weight"
        Cout = self.w_t.shape[0]

        # Free reshapes: NCHW -> (N, C, H*W); pixels already contiguous on the lane dim.
        x_parts = [p.reshape(N, p.shape[1], P).astype(jnp.float32) for p in parts]

        # Split the (Cout, Cin) weight into per-part row slices (tiny, done once).
        w_parts = []
        off = 0
        for p in parts:
            c = p.shape[1]
            w_parts.append(self.w_t[:, off:off + c])
            off += c

        target = batch['hm'].reshape(N, Cout, P).astype(jnp.float32)

        y, loss_part = fused_model_and_loss(x_parts, w_parts, self.b, target)

        outputs = y.reshape(N, Cout, H, W)                       # free reshape, still NCHW
        loss = jnp.sum(loss_part) / jnp.float32(y.size)          # mean over all elements
        loss_stats = {'loss': loss, 'hm_loss': loss}
        return outputs, loss, loss_stats


if __name__ == "__main__":
    key = jax.random.PRNGKey(0)
    k_img, k_pre, k_prev, k_hm, k_tgt, k_w, k_b = jax.random.split(key, 7)

    N, C, H, W = 2, 4, 16, 16
    C_out = 8

    batch = {
        'image': jax.random.normal(k_img, (N, C, H, W), jnp.float32),
        'pre_img': jax.random.normal(k_pre, (N, C, H, W), jnp.float32),
        'prev_frames': [jax.random.normal(k_prev, (N, C, H, W), jnp.float32)],
        'pre_hm': jax.random.uniform(k_hm, (N, 1, H, W), jnp.float32),
        'hm': jax.random.uniform(k_tgt, (N, C_out, H, W), jnp.float32),
    }
    args = SimpleNamespace(pre_hm=True)

    C_in = C + C + C + 1  # image + pre_img + one prev_frame + pre_hm = 13
    w = jax.random.normal(k_w, (C_in, C_out), jnp.float32) * 0.1
    b = jax.random.normal(k_b, (1, C_out), jnp.float32) * 0.01

    module = ModelWithLoss(w, b, args)
    outputs, loss, loss_stats = module(batch)
    jax.block_until_ready((outputs, loss))

    # Reference check in plain JAX (same math) to validate the fused kernel.
    inp = jnp.concatenate(
        [batch['image'],
         jnp.concatenate([batch['pre_img'], *batch['prev_frames']], axis=1),
         batch['pre_hm']], axis=1)
    x_ref = jnp.transpose(inp, (0, 2, 3, 1)).reshape(-1, C_in)
    y_ref = jax.nn.sigmoid(x_ref @ w + b)
    t_ref = jnp.transpose(batch['hm'], (0, 2, 3, 1)).reshape(-1, C_out)
    loss_ref = jnp.mean((y_ref - t_ref) ** 2)
    out_ref = jnp.transpose(y_ref.reshape(N, H, W, C_out), (0, 3, 1, 2))

    assert outputs.shape == (N, C_out, H, W)
    assert jnp.allclose(outputs, out_ref, atol=1e-5, rtol=1e-5)
    assert jnp.allclose(loss, loss_ref, atol=1e-6, rtol=1e-5)

    print("KERNEL_OK")
</pallas_src>

<mosaic_0001>
module attributes {stable_mosaic.version = 11 : i64} {
  func.func @kernel(%arg0: i32, %arg1: i32, %arg2: memref<1x4x256xf32, #tpu.memory_space<vmem>>, %arg3: memref<1x4x256xf32, #tpu.memory_space<vmem>>, %arg4: memref<1x4x256xf32, #tpu.memory_space<vmem>>, %arg5: memref<1x1x256xf32, #tpu.memory_space<vmem>>, %arg6: memref<8x4xf32, #tpu.memory_space<vmem>>, %arg7: memref<8x4xf32, #tpu.memory_space<vmem>>, %arg8: memref<8x4xf32, #tpu.memory_space<vmem>>, %arg9: memref<8x1xf32, #tpu.memory_space<vmem>>, %arg10: memref<8x1xf32, #tpu.memory_space<vmem>>, %arg11: memref<1x8x256xf32, #tpu.memory_space<vmem>>, %arg12: memref<1x8x256xf32, #tpu.memory_space<vmem>>, %arg13: memref<1x8x256xf32, #tpu.memory_space<vmem>>) attributes {dimension_semantics = [#tpu.dimension_semantics<parallel>, #tpu.dimension_semantics<arbitrary>], iteration_bounds = array<i64: 2, 1>, scalar_prefetch = 0 : i64, scratch_operands = 0 : i64, tpu.core_type = #tpu.core_type<tc>, window_params = [{transform_indices = @transform_0, window_bounds = array<i64: 1, 4, 256>}, {transform_indices = @transform_1, window_bounds = array<i64: 1, 4, 256>}, {transform_indices = @transform_2, window_bounds = array<i64: 1, 4, 256>}, {transform_indices = @transform_3, window_bounds = array<i64: 1, 1, 256>}, {pipeline_mode = #tpu.pipeline_mode<synchronous>, transform_indices = @transform_4, window_bounds = array<i64: 8, 4>}, {pipeline_mode = #tpu.pipeline_mode<synchronous>, transform_indices = @transform_5, window_bounds = array<i64: 8, 4>}, {pipeline_mode = #tpu.pipeline_mode<synchronous>, transform_indices = @transform_6, window_bounds = array<i64: 8, 4>}, {pipeline_mode = #tpu.pipeline_mode<synchronous>, transform_indices = @transform_7, window_bounds = array<i64: 8, 1>}, {pipeline_mode = #tpu.pipeline_mode<synchronous>, transform_indices = @transform_8, window_bounds = array<i64: 8, 1>}, {transform_indices = @transform_9, window_bounds = array<i64: 1, 8, 256>}, {transform_indices = @transform_10, window_bounds = array<i64: 1, 8, 256>}, {transform_indices = @transform_11, window_bounds = array<i64: 1, 8, 256>}]} {
    %c0_i32 = arith.constant 0 : i32
    %0 = arith.cmpi eq, %arg1, %c0_i32 : i32
    %1 = arith.extui %0 : i1 to i32
    %c0_i32_0 = arith.constant 0 : i32
    %2 = arith.cmpi ne, %1, %c0_i32_0 : i32
    scf.if %2 {
      %cst_37 = arith.constant 0.000000e+00 : f32
      %45 = vector.broadcast %cst_37 : f32 to vector<1x8x256xf32>
      %c0_38 = arith.constant 0 : index
      %c0_39 = arith.constant 0 : index
      %c0_40 = arith.constant 0 : index
      %46 = vector.load %arg13[%c0_38, %c0_39, %c0_40] : memref<1x8x256xf32, #tpu.memory_space<vmem>>, vector<1x8x256xf32>
      tpu.vector_store %arg13[%c0_38, %c0_39, %c0_40], %45 {strides = array<i32>} : memref<1x8x256xf32, #tpu.memory_space<vmem>>, vector<1x8x256xf32>,
    } else {
    }
    %c0 = arith.constant 0 : index
    %c0_1 = arith.constant 0 : index
    %3 = vector.load %arg6[%c0, %c0_1] : memref<8x4xf32, #tpu.memory_space<vmem>>, vector<8x4xf32>
    %c0_2 = arith.constant 0 : index
    %c0_3 = arith.constant 0 : index
    %c0_4 = arith.constant 0 : index
    %4 = vector.load %arg2[%c0_2, %c0_3, %c0_4] : memref<1x4x256xf32, #tpu.memory_space<vmem>>, vector<1x4x256xf32>
    %5 = vector.shape_cast %4 : vector<1x4x256xf32> to vector<4x256xf32>
    %cst = arith.constant dense<0.000000e+00> : vector<8x256xf32>
    %6 = tpu.matmul %3, %5, %cst {dimension_numbers = #tpu.dot_dimension_numbers<[1], [0], [0], [1], [0, 0, 1, 1], [], []>} : vector<8x4xf32>, vector<4x256xf32>, vector<8x256xf32> -> vector<8x256xf32>
    %c0_5 = arith.constant 0 : index
    %c0_6 = arith.constant 0 : index
    %7 = vector.load %arg7[%c0_5, %c0_6] : memref<8x4xf32, #tpu.memory_space<vmem>>, vector<8x4xf32>
    %c0_7 = arith.constant 0 : index
    %c0_8 = arith.constant 0 : index
    %c0_9 = arith.constant 0 : index
    %8 = vector.load %arg3[%c0_7, %c0_8, %c0_9] : memref<1x4x256xf32, #tpu.memory_space<vmem>>, vector<1x4x256xf32>
    %9 = vector.shape_cast %8 : vector<1x4x256xf32> to vector<4x256xf32>
    %cst_10 = arith.constant dense<0.000000e+00> : vector<8x256xf32>
    %10 = tpu.matmul %7, %9, %cst_10 {dimension_numbers = #tpu.dot_dimension_numbers<[1], [0], [0], [1], [0, 0, 1, 1], [], []>} : vector<8x4xf32>, vector<4x256xf32>, vector<8x256xf32> -> vector<8x256xf32>
    %11 = arith.addf %6, %10 : vector<8x256xf32>
    %c0_11 = arith.constant 0 : index
    %c0_12 = arith.constant 0 : index
    %12 = vector.load %arg8[%c0_11, %c0_12] : memref<8x4xf32, #tpu.memory_space<vmem>>, vector<8x4xf32>
    %c0_13 = arith.constant 0 : index
    %c0_14 = arith.constant 0 : index
    %c0_15 = arith.constant 0 : index
    %13 = vector.load %arg4[%c0_13, %c0_14, %c0_15] : memref<1x4x256xf32, #tpu.memory_space<vmem>>, vector<1x4x256xf32>
    %14 = vector.shape_cast %13 : vector<1x4x256xf32> to vector<4x256xf32>
    %cst_16 = arith.constant dense<0.000000e+00> : vector<8x256xf32>
    %15 = tpu.matmul %12, %14, %cst_16 {dimension_numbers = #tpu.dot_dimension_numbers<[1], [0], [0], [1], [0, 0, 1, 1], [], []>} : vector<8x4xf32>, vector<4x256xf32>, vector<8x256xf32> -> vector<8x256xf32>
    %16 = arith.addf %11, %15 : vector<8x256xf32>
    %c0_17 = arith.constant 0 : index
    %c0_18 = arith.constant 0 : index
    %17 = vector.load %arg9[%c0_17, %c0_18] : memref<8x1xf32, #tpu.memory_space<vmem>>, vector<8x1xf32>
    %c0_19 = arith.constant 0 : index
    %c0_20 = arith.constant 0 : index
    %c0_21 = arith.constant 0 : index
    %18 = vector.load %arg5[%c0_19, %c0_20, %c0_21] : memref<1x1x256xf32, #tpu.memory_space<vmem>>, vector<1x1x256xf32>
    %19 = vector.shape_cast %18 : vector<1x1x256xf32> to vector<1x256xf32>
    %20 = vector.broadcast %17 : vector<8x1xf32> to vector<8x256xf32>
    %21 = vector.broadcast %19 : vector<1x256xf32> to vector<8x256xf32>
    %22 = arith.mulf %20, %21 : vector<8x256xf32>
    %23 = arith.addf %16, %22 : vector<8x256xf32>
    %c0_22 = arith.constant 0 : index
    %c0_23 = arith.constant 0 : index
    %24 = vector.load %arg10[%c0_22, %c0_23] : memref<8x1xf32, #tpu.memory_space<vmem>>, vector<8x1xf32>
    %25 = vector.broadcast %24 : vector<8x1xf32> to vector<8x256xf32>
    %26 = arith.addf %23, %25 : vector<8x256xf32>
    %27 = arith.negf %26 : vector<8x256xf32>
    %28 = math.exp %27 : vector<8x256xf32>
    %cst_24 = arith.constant 1.000000e+00 : f32
    %29 = vector.broadcast %cst_24 : f32 to vector<8x256xf32>
    %30 = arith.addf %29, %28 : vector<8x256xf32>
    %31 = arith.divf %29, %30 : vector<8x256xf32>
    %c0_25 = arith.constant 0 : index
    %c0_26 = arith.constant 0 : index
    %c0_27 = arith.constant 0 : index
    %32 = vector.load %arg12[%c0_25, %c0_26, %c0_27] : memref<1x8x256xf32, #tpu.memory_space<vmem>>, vector<1x8x256xf32>
    %33 = vector.shape_cast %32 : vector<1x8x256xf32> to vector<8x256xf32>
    %34 = vector.shape_cast %31 : vector<8x256xf32> to vector<1x8x256xf32>
    tpu.vector_store %arg12[%c0_25, %c0_26, %c0_27], %34 {strides = array<i32>} : memref<1x8x256xf32, #tpu.memory_space<vmem>>, vector<1x8x256xf32>,
    %c0_28 = arith.constant 0 : index
    %c0_29 = arith.constant 0 : index
    %c0_30 = arith.constant 0 : index
    %35 = vector.load %arg11[%c0_28, %c0_29, %c0_30] : memref<1x8x256xf32, #tpu.memory_space<vmem>>, vector<1x8x256xf32>
    %36 = vector.shape_cast %35 : vector<1x8x256xf32> to vector<8x256xf32>
    %37 = arith.subf %31, %36 : vector<8x256xf32>
    %c0_31 = arith.constant 0 : index
    %c0_32 = arith.constant 0 : index
    %c0_33 = arith.constant 0 : index
    %38 = vector.load %arg13[%c0_31, %c0_32, %c0_33] : memref<1x8x256xf32, #tpu.memory_space<vmem>>, vector<1x8x256xf32>
    %39 = vector.shape_cast %38 : vector<1x8x256xf32> to vector<8x256xf32>
    %40 = arith.mulf %37, %37 : vector<8x256xf32>
    %41 = arith.addf %39, %40 : vector<8x256xf32>
    %c0_34 = arith.constant 0 : index
    %c0_35 = arith.constant 0 : index
    %c0_36 = arith.constant 0 : index
    %42 = vector.load %arg13[%c0_34, %c0_35, %c0_36] : memref<1x8x256xf32, #tpu.memory_space<vmem>>, vector<1x8x256xf32>
    %43 = vector.shape_cast %42 : vector<1x8x256xf32> to vector<8x256xf32>
    %44 = vector.shape_cast %41 : vector<8x256xf32> to vector<1x8x256xf32>
    tpu.vector_store %arg13[%c0_34, %c0_35, %c0_36], %44 {strides = array<i32>} : memref<1x8x256xf32, #tpu.memory_space<vmem>>, vector<1x8x256xf32>,
    return
  }
  func.func @transform_0(%arg0: i32, %arg1: i32) -> (i32, i32, i32) {
    %c0_i32 = arith.constant 0 : i32
    %c0_i32_0 = arith.constant 0 : i32
    return %arg0, %c0_i32, %arg1 : i32, i32, i32
  }
  func.func @transform_1(%arg0: i32, %arg1: i32) -> (i32, i32, i32) {
    %c0_i32 = arith.constant 0 : i32
    %c0_i32_0 = arith.constant 0 : i32
    return %arg0, %c0_i32, %arg1 : i32, i32, i32
  }
  func.func @transform_2(%arg0: i32, %arg1: i32) -> (i32, i32, i32) {
    %c0_i32 = arith.constant 0 : i32
    %c0_i32_0 = arith.constant 0 : i32
    return %arg0, %c0_i32, %arg1 : i32, i32, i32
  }
  func.func @transform_3(%arg0: i32, %arg1: i32) -> (i32, i32, i32) {
    %c0_i32 = arith.constant 0 : i32
    %c0_i32_0 = arith.constant 0 : i32
    return %arg0, %c0_i32, %arg1 : i32, i32, i32
  }
  func.func @transform_4(%arg0: i32, %arg1: i32) -> (i32, i32) {
    %c0_i32 = arith.constant 0 : i32
    %c0_i32_0 = arith.constant 0 : i32
    %c0_i32_1 = arith.constant 0 : i32
    return %c0_i32, %c0_i32_0 : i32, i32
  }
  func.func @transform_5(%arg0: i32, %arg1: i32) -> (i32, i32) {
    %c0_i32 = arith.constant 0 : i32
    %c0_i32_0 = arith.constant 0 : i32
    %c0_i32_1 = arith.constant 0 : i32
    return %c0_i32, %c0_i32_0 : i32, i32
  }
  func.func @transform_6(%arg0: i32, %arg1: i32) -> (i32, i32) {
    %c0_i32 = arith.constant 0 : i32
    %c0_i32_0 = arith.constant 0 : i32
    %c0_i32_1 = arith.constant 0 : i32
    return %c0_i32, %c0_i32_0 : i32, i32
  }
  func.func @transform_7(%arg0: i32, %arg1: i32) -> (i32, i32) {
    %c0_i32 = arith.constant 0 : i32
    %c0_i32_0 = arith.constant 0 : i32
    %c0_i32_1 = arith.constant 0 : i32
    return %c0_i32, %c0_i32_0 : i32, i32
  }
  func.func @transform_8(%arg0: i32, %arg1: i32) -> (i32, i32) {
    %c0_i32 = arith.constant 0 : i32
    %c0_i32_0 = arith.constant 0 : i32
    %c0_i32_1 = arith.constant 0 : i32
    return %c0_i32, %c0_i32_0 : i32, i32
  }
  func.func @transform_9(%arg0: i32, %arg1: i32) -> (i32, i32, i32) {
    %c0_i32 = arith.constant 0 : i32
    %c0_i32_0 = arith.constant 0 : i32
    return %arg0, %c0_i32, %arg1 : i32, i32, i32
  }
  func.func @transform_10(%arg0: i32, %arg1: i32) -> (i32, i32, i32) {
    %c0_i32 = arith.constant 0 : i32
    %c0_i32_0 = arith.constant 0 : i32
    return %arg0, %c0_i32, %arg1 : i32, i32, i32
  }
  func.func @transform_11(%arg0: i32, %arg1: i32) -> (i32, i32, i32) {
    %c0_i32 = arith.constant 0 : i32
    %c0_i32_0 = arith.constant 0 : i32
    %c0_i32_1 = arith.constant 0 : i32
    return %arg0, %c0_i32, %c0_i32_0 : i32, i32, i32
  }
}

</mosaic_0001>

<bundles_post_ra>
// kernel: tpu_custom_call.1
= control target key start
LH: loop header
LB: loop body
LE: loop exit
PB: predicated region body
PF: predicated region fallthrough
CT: control target
= control target key end

     0   :  { %s1810_s0 = inlined_call_operand.vmem [shape: f32[2,4,256], index: 0, kind: input, shape index: {}]   ;;  %s1811_s1 = inlined_call_operand.vmem [shape: f32[2,4,256], index: 1, kind: input, shape index: {}]   ;;  %s1812_s2 = inlined_call_operand.hbm [shape: f32[2,4,256], index: 2, kind: input, shape index: {}]   ;;  %s1813_s3 = inlined_call_operand.hbm [shape: f32[2,1,256], index: 3, kind: input, shape index: {}]   ;;  %s1814_s4 = inlined_call_operand.vmem [shape: f32[8,4], index: 4, kind: input, shape index: {}]   ;;  %s1815_s5 = inlined_call_operand.vmem [shape: f32[8,4], index: 5, kind: input, shape index: {}]   ;;  %s1816_s6 = inlined_call_operand.vmem [shape: f32[8,4], index: 6, kind: input, shape index: {}]   ;;  %s1817_s7 = inlined_call_operand.vmem [shape: f32[8,1], index: 7, kind: input, shape index: {}]   ;;  %s1818_s8 = inlined_call_operand.vmem [shape: f32[8,1], index: 8, kind: input, shape index: {}]   ;;  %s1819_s9 = inlined_call_operand.vmem [shape: f32[2,8,256], index: 9, kind: input, shape index: {}]   ;;  %s1820_s10 = inlined_call_operand.hbm [shape: f32[2,8,256], index: 10, kind: output, shape index: {0}]   ;;  %s1821_s11 = inlined_call_operand.hbm [shape: f32[2,8,256], index: 11, kind: output, shape index: {1}]  }
   0x1   :  { %1828 = sst [smem:[#allocation19_spill]] %s1812_s2 }
   0x2   :  { %17 = vsyncpa [#allocation3], 0 }
   0x3   :  { %19 = vsyncpa [#allocation3 + $0x1], 0 }
   0x4   :  { %20 = vsyncpa [#allocation6], 0 }
   0x5   :  { %22 = vsyncpa [#allocation6 + $0x1], 0 }
   0x6   :  { %23 = vsyncpa [#allocation4], 0 }
   0x7   :  { %25 = vsyncpa [#allocation4 + $0x1], 0 }
   0x8   :  { %26 = vsyncpa [#allocation9], 0 }
   0x9   :  { %28 = vsyncpa [#allocation9 + $0x1], 0  ;;  %s1512_s17 = smov 0   ;;  %s1514_s18 = smov 0  }
   0xa   :  { %s1516_s19 = smov 0   ;;  %s1518_s20 = smov 0  }
   0xb   :  { %s1520_s21 = smov 0   ;;  %s1522_s22 = smov 0  }
   0xc LB: > { %1829 = sst [smem:[#allocation14_spill]] %s1432_s19  ;;  %s1129_s23 = sadd.s32 4294967295, %s1444_s22   ;;  %s1444_s22 = sphi %s1522_s22, %s34_s22   ;;  %s1440_s21 = sphi %s1520_s21, %s1852_s21   ;;  %s1436_s20 = sphi %s1518_s20, %s1851_s20   ;;  %s1432_s19 = sphi %s1516_s19, %s1850_s19   ;;  %s1428_s18 = sphi %s1514_s18, %s1854_s18   ;;  %s1424_s17 = sphi %s1512_s17, %s1853_s17  }
   0xd   : > { %1830 = sst [smem:[#allocation15_spill]] %s1440_s21  ;;  %s1130_s24 = sadd.s32 4294967294, %s1444_s22  }
   0xe   : > { %s46_s25 = sadd.s32 1, %s1440_s21  ;;  %s111_s26 = sadd.s32 1, %s1432_s19 }
   0xf   : > { %p48_p0 = scmp.ge.s32.totalorder %s46_s25, 2  ;;  %p118_p1 = scmp.ne.s32.totalorder %s1432_s19, %s1428_s18 }
  0x10   : > { %p119_p2 = scmp.eq.s32.totalorder %s1444_s22, 0  ;;  %p124_p3 = scmp.ne.s32.totalorder %s1428_s18, %s1424_s17 }
  0x11   : > { %s1856_s25 = smov (%p48_p0, %s46_s25), 0  ;;  %p125_p5 = scmp.eq.s32.totalorder %s1129_s23, 0 }
  0x12   : > { %1831 = sst [smem:[#allocation16_spill]] %s1856_s25  ;;  %p1553_p4 = por %p119_p2, %p118_p1 }
  0x13   : > { %s106_s28 = ssub.s32 %s1440_s21, %s1856_s25  ;;  %p311_p6 = scmp.eq.s32.totalorder %s1129_s23, 1 }
  0x14   : > { %p109_p7 = scmp.eq.s32.totalorder %s106_s28, 0  ;;  %p1559_p8 = por %p125_p5, %p124_p3 }
  0x15   : > { %p1563_p9 = por %p311_p6, %p118_p1  ;;  %p317_p10 = scmp.eq.s32.totalorder %s1130_s24, 1 }
  0x16   : > { %s1833_s29 = scalar_select %p1559_p8, 1, 0 }
  0x17   : > { %s1834_s30 = scalar_select %p1563_p9, 1, 0 }
  0x18   : > { %s1568_s12 = scalar_select %p109_p7, %s1432_s19, %s111_s26  }
  0x19   : > { %p1570_p11 = por %p317_p10, %p124_p3  ;;  %p1202_p13 = scmp.lt.s32.totalorder %s1444_s22, 2 }
  0x1a   : > { %1835 = sst [smem:[#allocation17_spill]] %s1568_s12  ;;  %s1577_s14 = sand.u32 1, %s1432_s19  }
  0x1b   : > { %s1836_s13 = scalar_select %p1570_p11, 1, 0 }
  0x1c   : > { %s1133_s15 = sshll.u32 %s1577_s14, 3  ;;  %s1169_s16 = sshll.u32 %s1440_s21, 7 }
  0x1d   : > { %1837 = sst [smem:[#allocation18_spill]] %s1836_s13  ;;  %s1838_s2 = sld [smem:[#allocation19_spill]] }
  0x1e   : > { %s408_s24 = scalar_lea.vmem [#allocation2], %s1133_s15  ;;  %p1590_p0 = pnand %p1202_p13, %p1553_p4 }
  0x1f   : > { %s418_s26 = sshll.u32 %s408_s24, 4  ;;  %s405_s23 = scalar_lea.sflag [#allocation3], %s1577_s14  ;;  %s1586_s26 = int_to_ptr.vmem [resolvable:$true] %s418_s26 }
  0x20   : > { %p1268_p5 = pneg %p1590_p0 }
  0x23   : > { %s1584_s25 = scalar_lea.hbm %s1838_s2, %s1169_s16  ;;  %s1271_s27 = scalar_lea.hbm %s1838_s2, 256 }
  0x24   : > { %s1266_s16 = scalar_lea.hbm %s1584_s25, 128  ;;  %p1272_p4 = scmp.lt.u32.totalorder %s1584_s25, %s1838_s2 }
  0x25   : > { %p1267_p3 = scmp.ne.s32.totalorder %s1584_s25, %s1266_s16  ;;  %p1273_p10 = scmp.lt.u32.totalorder %s1271_s27, %s1266_s16 }
  0x26   : > { %p1275_p12 = scmp.lt.u32.totalorder %s1266_s16, %s1584_s25 }
  0x27   : > { %p1269_p6 = pnand %p1268_p5, %p1267_p3  ;;  %p1274_p13 = por %p1273_p10, %p1272_p4 }
  0x29   : > { %p1270_p7 = pneg %p1269_p6  ;;  %p1276_p1 = por %p1275_p12, %p1274_p13 }
  0x2b   : > { %p1277_p2 = pnand %p1276_p1, %p1270_p7 }
  0x2d   : > { %1280 = shalt.err (!%p1277_p2)
}
  0x2e   : > { %s1281_s13 = scalar_lea.vmem %s1586_s26, 128  ;;  %s1446_s15 = smov [#allocation2]  }
  0x2f   : > { %p1282_p3 = scmp.ne.s32.totalorder %s1586_s26, %s1281_s13  ;;  %s1286_s28 = sshll.u32 %s1446_s15, 4  ;;  %s1287_s28 = int_to_ptr.vmem [resolvable:$false] %s1286_s28 }
  0x30   : > { %s1288_s19 = scalar_lea.vmem %s1287_s28, 256  ;;  %p1289_p9 = scmp.lt.s32.totalorder %s1586_s26, %s1287_s28 }
  0x31   : > { %p1284_p6 = pnand %p1282_p3, %p1268_p5  ;;  %p1290_p4 = scmp.lt.s32.totalorder %s1288_s19, %s1281_s13 }
  0x33   : > { %p1285_p11 = pneg %p1284_p6  ;;  %p1291_p10 = por %p1290_p4, %p1289_p9 }
  0x35   : > { %p1292_p12 = pnand %p1291_p10, %p1285_p11 }
  0x37   : > { %1295 = shalt.err (!%p1292_p12)
}
  0x38   : > { %1191 = dma.hbm_to_vmem [thread:$0]  (!%p1590_p0), %s1584_s25, 128, %s1586_s26, %s405_s23  }
  0x39   : > { %p1840_p1 = scmp.lt.s32.totalorder %s1444_s22, 3  ;;  %p1841_p2 = scmp.ge.s32.totalorder %s1444_s22, 1 }
  0x3a   : > { %s1136_s13 = sshll.u32 %s1577_s14, 1  ;;  %s1170_s27 = sshll.u32 %s1440_s21, 5 }
  0x3b   : > { %p1626_p7 = pnand %p1841_p2, %p1840_p1  ;;  %s1635_s28 = scalar_lea.hbm %s1813_s3, %s1170_s27 }
  0x3c   : > { %s429_s19 = scalar_lea.vmem [#allocation5], %s1136_s13  ;;  %s426_s25 = scalar_lea.sflag [#allocation6], %s1577_s14 }
  0x3d   : > { %s1842_s16 = scalar_select %p1626_p7, 1, 0 }
  0x3e   : > { %s439_s2 = sshll.u32 %s429_s19, 4  ;;  %s1296_s26 = scalar_lea.hbm %s1635_s28, 32  ;;  %s440_s2 = int_to_ptr.vmem [resolvable:$true] %s439_s2 }
  0x3f   : > { %p1297_p9 = scmp.ne.s32.totalorder %s1635_s28, %s1296_s26  ;;  %s1301_s24 = scalar_lea.hbm %s1813_s3, 64 }
  0x40   : > { %p1302_p3 = scmp.lt.u32.totalorder %s1635_s28, %s1813_s3  ;;  %p1303_p6 = scmp.lt.u32.totalorder %s1301_s24, %s1296_s26 }
  0x41   : > { %p1299_p11 = pnand %p1297_p9, %p1268_p5  ;;  %p1305_p10 = scmp.lt.u32.totalorder %s1296_s26, %s1635_s28 }
  0x42   : > { %p1304_p4 = por %p1303_p6, %p1302_p3 }
  0x43   : > { %p1300_p13 = pneg %p1299_p11 }
  0x44   : > { %p1306_p12 = por %p1305_p10, %p1304_p4 }
  0x46   : > { %p1307_p1 = pnand %p1306_p12, %p1300_p13 }
  0x48   : > { %1310 = shalt.err (!%p1307_p1)
}
  0x49   : > { %s1311_s14 = scalar_lea.vmem %s440_s2, 32  ;;  %s1447_s13 = smov [#allocation5]  }
  0x4a   : > { %p1312_p2 = scmp.ne.s32.totalorder %s440_s2, %s1311_s14  ;;  %s1316_s21 = sshll.u32 %s1447_s13, 4  ;;  %s1317_s21 = int_to_ptr.vmem [resolvable:$false] %s1316_s21 }
  0x4b   : > { %s1318_s19 = scalar_lea.vmem %s1317_s21, 64  ;;  %p1319_p8 = scmp.lt.s32.totalorder %s440_s2, %s1317_s21 }
  0x4c   : > { %p1314_p9 = pnand %p1312_p2, %p1268_p5  ;;  %p1320_p7 = scmp.lt.s32.totalorder %s1318_s19, %s1311_s14 }
  0x4e   : > { %p1315_p11 = pneg %p1314_p9  ;;  %p1321_p3 = por %p1320_p7, %p1319_p8 }
  0x50   : > { %p1322_p6 = pnand %p1321_p3, %p1315_p11 }
  0x52   : > { %1325 = shalt.err (!%p1322_p6)
}
  0x53   : > { %1194 = dma.hbm_to_vmem [thread:$0]  (!%p1590_p0), %s1635_s28, 32, %s440_s2, %s426_s25  }
  0x54   : > { %p1843_p13 = scmp.ne.s32.totalorder %s1842_s16, 0 }
  0x55   : > { %s1660_s26 = sand.u32 (!%p1843_p13), 1, %s1428_s18   ;;  %p1844_p5 = scmp.ne.s32.totalorder (!%p1843_p13), %s1833_s29, 0 }
  0x56   : > { %461 = sbr.rel (%p1843_p13) target bundleno = 399 (0x18f), region = 60  ;;  %s1140_s23 = sshll.u32 (!%p1843_p13), %s1660_s26, 3 }
  0x57   : > { %s464_s24 = scalar_lea.sflag (!%p1843_p13), [#allocation3], %s1660_s26  ;;  %s467_s27 = scalar_lea.vmem (!%p1843_p13), [#allocation2], %s1140_s23 }
  0x5d   : > { %1407 = dma.done.wait (%p1844_p5), %s464_s24, 128  }
  0x5e   : > { %1409 = vsyncadd (%p1844_p5), %s464_s24, 4294967168  ;;  %s1141_s2 = sshll.u32 %s1660_s26, 1  ;;  %s473_s12 = scalar_lea.sflag [#allocation6], %s1660_s26 }
  0x5f   : > { %s1670_s16 = scalar_lea.vmem [#allocation5], %s1141_s2 }
  0x60   : > { %1411 = dma.done.wait (%p1844_p5), %s473_s12, 32  }
  0x61   : > { %1413 = vsyncadd (%p1844_p5), %s473_s12, 4294967264  ;;  %p553_p8 = scmp.lt.s32.totalorder %s1436_s20, 1  ;;  %v1448_v0 = vmov 0.0   ;;  %v1449_v1 = vmov 0   ;;  %vm601_vm0 = vcmask 1043456   ;;  %v758_v4 = vld [vmem:[%s467_s27] sm:$0xff]  ;;  %v849_v13 = vlaneseq }
  0x62   : > { %750 = vmatprep.mubr.f32.mxu0 %v1448_v0  ;;  %670 = vmatprep.mubr.f32.mxu1 %v1448_v0  ;;  %v591_v6 = vld [vmem:[%s1814_s4] sm:$0xff]  ;;  %vm597_vm1 = vcmask 31744   ;;  %v760_v7 = vcombine.high %v758_v4, %v758_v4  ;;  %v842_v16 = vld [vmem:[%s1670_s16] sm:$0x3]  ;;  %s1142_s19 = sshll.u32 %s1660_s26, 4  ;;  %s1174_s2 = sshll.u32 %s1436_s20, 8 }
  0x63   : > { %s1678_s28 = scalar_select %p553_p8, %s1436_s20, 1  ;;  %1254 = vset.pattern.permute.xlu0 %v1449_v1  ;;  %v841_v9 = vld [vmem:[%s1817_s7] sm:$0xff]  ;;  %v850_v14 = vshrl.u32 %v849_v13, 7 }
  0x64   : > { %845 = vperm.xlu0 %1254, %v841_v9   ;;  %v593_v10 = vld [vmem:[%s1815_s5] sm:$0xff]  ;;  %s544_s12 = scalar_lea.vmem [#allocation7], %s1142_s19  ;;  %s1723_s14 = scalar_lea.hbm %s1820_s10, %s1174_s2 }
  0x65   : > { %s1171_s25 = sshll.u32 %s1678_s28, 3  ;;  %v863_v11 = vld [vmem:[%s1818_s8] sm:$0xff]  ;;  %v851_v15 = vsub.s32 0, %v850_v14  ;;  %v855_v17 = vsub.s32 1, %v850_v14  ;;  %s1173_s16 = sshll.u32 %s1678_s28, 4 }
  0x66   : > { %s560_s13 = scalar_lea.vmem %s1810_s0, %s1171_s25  ;;  %s570_s29 = scalar_lea.vmem %s1811_s1, %s1171_s25  ;;  %v757_v12 = vld [vmem:[%s1816_s6] sm:$0xff] }
  0x67   : > { %v592_v2 = vld [vmem:[%s560_s13] sm:$0xff]  ;;  %v852_v19 = vrot.slane %v842_v16, %v851_v15  ;;  %v856_v21 = vrot.slane %v842_v16, %v855_v17  ;;  %s582_s24 = scalar_lea.vmem %s1819_s9, %s1173_s16  ;;  %s919_s27 = sshll.u32 %s544_s12, 4  ;;  %s1725_s27 = int_to_ptr.vmem [resolvable:$true] %s919_s27 }
  0x68   : > { %v678_v3 = vcombine.high %v592_v2, %v592_v2  ;;  %v594_v5 = vld [vmem:[%s570_s29] sm:$0xff]  ;;  %866 = vperm.xlu0 %1254, %v863_v11   ;;  %v886_v41 = vld [vmem:[%s582_s24 + $0x8] sm:$0xff]  ;;  %s1727_s28 = scalar_lea.vmem [#allocation8], %s1142_s19  ;;  %s898_s21 = scalar_lea.sflag [#allocation4], %s1660_s26 }
  0x69   : > { %v596_v8 = vcombine.high %v594_v5, %v594_v5  ;;  %v885_v40 = vld [vmem:[%s582_s24] sm:$0xff]  ;;  %s933_s13 = sshll.u32 %s1727_s28, 4  ;;  %s1326_s16 = scalar_lea.vmem %s1725_s27, 256  ;;  %s1761_s13 = int_to_ptr.vmem [resolvable:$true] %s933_s13 }
  0x6a   : > { %1153 = vmatprep.subr.msk.mxu0 %vm601_vm0, %v678_v3  ;;  %p1327_p0 = scmp.ne.s32.totalorder %s1725_s27, %s1326_s16  ;;  %p1845_p7 = scmp.ne.s32.totalorder %s1834_s30, 0 }
  0x6b   : > { %1154 = vmatpush1.msk.msra.mxu0 %vm601_vm0, %v592_v2  ;;  %1150 = vmatprep.subr.msk.mxu1 %vm601_vm0, %v596_v8  ;;  %s1450_s29 = smov [#allocation7]  }
  0x6c   : > { %1155 = vmatmul.mubr.msk.f32.vlgmr.msra.gmra.mrb[0].mxu0 %vm597_vm1, %v591_v6  ;;  %1156 = vmatprep.subr.msk.mxu0 %vm601_vm0, %v760_v7  ;;  %p1328_p4 = pnand %p1327_p0, %p1845_p7  ;;  %s1330_s23 = sshll.u32 %s1450_s29, 4  ;;  %s1331_s23 = int_to_ptr.vmem [resolvable:$false] %s1330_s23 }
  0x6d   : > { %1157 = vmatpush1.msk.msra.mxu0 %vm601_vm0, %v758_v4  ;;  %1151 = vmatpush1.msk.msra.mxu1 %vm601_vm0, %v594_v5  ;;  %s1332_s24 = scalar_lea.vmem %s1331_s23, 512  ;;  %p1333_p12 = scmp.lt.s32.totalorder %s1725_s27, %s1331_s23 }
  0x6e   : > { %832 = vmatprep.mubr.f32.mxu0 %v1448_v0  ;;  %1152 = vmatmul.mubr.msk.f32.vlgmr.msra.gmra.mrb[0].mxu1 %vm597_vm1, %v593_v10  ;;  %p1329_p10 = pneg %p1328_p4  ;;  %p1334_p1 = scmp.lt.s32.totalorder %s1332_s24, %s1326_s16 }
  0x70   : > { %p1335_p2 = por %p1334_p1, %p1333_p12 }
  0x72   : > { %p1336_p9 = pnand %p1335_p2, %p1329_p10 }
  0x74   : > { %1158 = vmatmul.mubr.msk.f32.vlgmr.msra.gmra.mrb[0].mxu0 %vm597_vm1, %v757_v12 }
  0xe3   : > { %v846_v22 = vpop.permute.xlu0 %845 }
  0xe4   : > { %v859_v23 = vmul.f32 %v852_v19, %v846_v22  ;;  %v860_v24 = vmul.f32 %v856_v21, %v846_v22 }
  0xe7   : > { %v867_v30 = vpop.permute.xlu0 %866 }
 0x141   : > { %v672_v18 = vpop.f32.mrb[0].mxu1 }
 0x142   : > { %v674_v20 = vpop.f32.mrb[1].mxu1 }
 0x147   : > { %v834_v25 = vpop.f32.mrb[0].mxu0 }
 0x148   : > { %v1176_v26 = vadd.f32 %v834_v25, %v672_v18  ;;  %v836_v27 = vpop.f32.mrb[1].mxu0 }
 0x149   : > { %v1177_v28 = vadd.f32 %v836_v27, %v674_v20 }
 0x14a   : > { %v861_v29 = vadd.f32 %v1176_v26, %v859_v23 }
 0x14b   : > { %v862_v31 = vadd.f32 %v1177_v28, %v860_v24 }
 0x14c   : > { %v869_v32 = vadd.f32 %v867_v30, %v861_v29 }
 0x14d   : > { %v870_v33 = vadd.f32 %v867_v30, %v862_v31 }
 0x14e   : > { %v1159_v34 = vmul.f32 -1.442695, %v869_v32 }
 0x14f   : > { %v1160_v35 = vmul.f32 -1.442695, %v870_v33 }
 0x150   : > { %1258 = vpow2.f32 %v1159_v34 }
 0x151   : > { %1260 = vpow2.f32 %v1160_v35 }
 0x15a   : > { %v1259_v36 = vpop.eup %1258 }
 0x15b   : > { %v1261_v37 = vpop.eup %1260  ;;  %v877_v38 = vadd.f32 1.0, %v1259_v36 }
 0x15c   : > { %v878_v39 = vadd.f32 1.0, %v1261_v37 }
 0x15d   : > { %1262 = vrcp.f32 %v877_v38 }
 0x15e   : > { %1264 = vrcp.f32 %v878_v39 }
 0x167   : > { %v1263_v42 = vpop.eup %1262 }
 0x168   : > { %v1265_v43 = vpop.eup %1264  ;;  %v887_v44 = vsub.f32 %v1263_v42, %v885_v40  ;;  %883 = vst [vmem:[%s544_s12] sm:$0xff] %v1263_v42 }
 0x169   : > { %v888_v45 = vsub.f32 %v1265_v43, %v886_v41  ;;  %884 = vst [vmem:[%s544_s12 + $0x8] sm:$0xff] %v1265_v43 }
 0x16a   : > { %v891_v46 = vmul.f32 %v887_v44, %v887_v44 }
 0x16b   : > { %1339 = shalt.err (!%p1336_p9)
}
 0x16c   : > { %s1340_s19 = scalar_lea.hbm %s1723_s14, 256  ;;  %s1344_s15 = scalar_lea.hbm %s1820_s10, 512 }
 0x16d   : > { %p1341_p11 = scmp.ne.s32.totalorder %s1723_s14, %s1340_s19  ;;  %p1345_p13 = scmp.lt.u32.totalorder %s1723_s14, %s1820_s10 }
 0x16e   : > { %p1346_p5 = scmp.lt.u32.totalorder %s1344_s15, %s1340_s19  ;;  %p1348_p0 = scmp.lt.u32.totalorder %s1340_s19, %s1723_s14 }
 0x16f   : > { %p1342_p3 = pnand %p1341_p11, %p1845_p7 }
 0x170   : > { %p1347_p8 = por %p1346_p5, %p1345_p13 }
 0x171   : > { %p1343_p6 = pneg %p1342_p3 }
 0x172   : > { %p1349_p4 = por %p1348_p0, %p1347_p8 }
 0x174   : > { %p1350_p10 = pnand %p1349_p4, %p1343_p6 }
 0x176   : > { %1353 = shalt.err (!%p1350_p10)
}
 0x177   : > { %1184 = dma.vmem_to_hbm [thread:$0]  (%p1845_p7), %s1725_s27, 256, %s1723_s14, %s898_s21   ;;  %v892_v47 = vmul.f32 %v888_v45, %v888_v45  ;;  %895 = vst [vmem:[%s1727_s28] sm:$0xff] %v891_v46 }
 0x178   : > { %s1757_s19 = scalar_lea.hbm %s1821_s11, %s1174_s2  ;;  %s903_s12 = scalar_lea.sflag [#allocation9], %s1660_s26 }
 0x179   : > { %896 = vst [vmem:[%s1727_s28 + $0x8] sm:$0xff] %v892_v47  ;;  %s1354_s25 = scalar_lea.vmem %s1761_s13, 256  ;;  %s1451_s20 = smov [#allocation8]  }
 0x17a   : > { %p1355_p12 = scmp.ne.s32.totalorder %s1761_s13, %s1354_s25  ;;  %s1358_s27 = sshll.u32 %s1451_s20, 4  ;;  %s1359_s27 = int_to_ptr.vmem [resolvable:$false] %s1358_s27 }
 0x17b   : > { %s1360_s14 = scalar_lea.vmem %s1359_s27, 512  ;;  %p1361_p9 = scmp.lt.s32.totalorder %s1761_s13, %s1359_s27 }
 0x17c   : > { %p1356_p1 = pnand %p1355_p12, %p1845_p7  ;;  %p1362_p11 = scmp.lt.s32.totalorder %s1360_s14, %s1354_s25 }
 0x17e   : > { %p1357_p2 = pneg %p1356_p1  ;;  %p1363_p3 = por %p1362_p11, %p1361_p9 }
 0x180   : > { %p1364_p6 = pnand %p1363_p3, %p1357_p2 }
 0x182   : > { %1367 = shalt.err (!%p1364_p6)
}
 0x183   : > { %s1368_s26 = scalar_lea.hbm %s1757_s19, 256  ;;  %s1372_s21 = scalar_lea.hbm %s1821_s11, 512 }
 0x184   : > { %p1369_p13 = scmp.ne.s32.totalorder %s1757_s19, %s1368_s26  ;;  %p1373_p0 = scmp.lt.u32.totalorder %s1757_s19, %s1821_s11 }
 0x185   : > { %p1374_p4 = scmp.lt.u32.totalorder %s1372_s21, %s1368_s26  ;;  %p1376_p12 = scmp.lt.u32.totalorder %s1368_s26, %s1757_s19 }
 0x186   : > { %p1370_p5 = pnand %p1369_p13, %p1845_p7 }
 0x187   : > { %p1375_p10 = por %p1374_p4, %p1373_p0 }
 0x188   : > { %p1371_p8 = pneg %p1370_p5 }
 0x189   : > { %p1377_p1 = por %p1376_p12, %p1375_p10 }
 0x18b   : > { %p1378_p2 = pnand %p1377_p1, %p1371_p8 }
 0x18d   : > { %1381 = shalt.err (!%p1378_p2)
}
 0x18e   : > { %1185 = dma.vmem_to_hbm [thread:$0]  (%p1845_p7), %s1761_s13, 256, %s1757_s19, %s903_s12  }
 0x18f PF: > { %s1846_s23 = sld [smem:[#allocation18_spill]]  ;;  %s945_s16 = sand.u32 1, %s1424_s17  }
 0x190   : > { %p1848_p11 = scmp.ge.s32.totalorder %s1444_s22, 2  ;;  %s946_s24 = scalar_lea.sflag [#allocation4], %s945_s16 }
 0x195   : > { %p1847_p9 = scmp.ne.s32.totalorder %s1846_s23, 0 }
 0x197   : > { %p1196_p3 = pnand %p1848_p11, %p1847_p9 }
 0x199   : > { %1415 = dma.done.wait (!%p1196_p3), %s946_s24, 256  }
 0x19a   : > { %1417 = vsyncadd (!%p1196_p3), %s946_s24, 4294967040  ;;  %s955_s25 = scalar_lea.sflag [#allocation9], %s945_s16 }
 0x19b   : > { %1419 = dma.done.wait (!%p1196_p3), %s955_s25, 256  }
 0x19c   : > { %1421 = vsyncadd (!%p1196_p3), %s955_s25, 4294967040  ;;  %s34_s22 = sadd.s32 1, %s1444_s22   ;;  %s1849_s30 = sld [smem:[#allocation14_spill]] }
 0x19d   : > { %p31_p6 = scmp.ge.s32.totalorder %s34_s22, 4   ;;  %s1850_s19 = sld [smem:[#allocation17_spill]] }
 0x19e   : > { %s1851_s20 = sld [smem:[#allocation15_spill]]  ;;  %s1852_s21 = sld [smem:[#allocation16_spill]] }
 0x19f   : > { %s1853_s17 = smov %s1428_s18  ;;  %33 = sbr.rel (!%p31_p6) target bundleno = 12 (0xc), region = 148 }
 0x1a2   : > { %s1854_s18 = smov %s1849_s30 }
 0x1a6   :  { %960 = vsyncpa [#allocation3], 1 }
 0x1a7   :  { %962 = vsyncpa [#allocation3 + $0x1], 1 }
 0x1a8   :  { %963 = vsyncpa [#allocation6], 1 }
 0x1a9   :  { %965 = vsyncpa [#allocation6 + $0x1], 1 }
 0x1aa   :  { %966 = vsyncpa [#allocation4], 1 }
 0x1ab   :  { %968 = vsyncpa [#allocation4 + $0x1], 1 }
 0x1ac   :  { %969 = vsyncpa [#allocation9], 1 }
 0x1ad   :  { %971 = vsyncpa [#allocation9 + $0x1], 1 }

</bundles_post_ra>
